<compile_context>
chip_gen: v7x
topology: tpu7x:2x2x1
jax: 0.10.0
libtpu: 0.0.40
codegen_flags: <defaults>
</compile_context>

<pallas_src>
import functools

import jax
import jax.numpy as jnp
from jax.experimental import pallas as pl
from jax.experimental.pallas import tpu as pltpu

_LANE = 128      # lane width  (last-dim alignment)
_SUBLANE = 8     # sublane width (second-to-last-dim alignment)


def _round_up(n: int, m: int) -> int:
    return ((n + m - 1) // m) * m


def _vmem_ceiling_bytes() -> int:
    """Generation-aware per-core VMEM budget with a v7x-safe fallback."""
    try:
        cap = int(pltpu.get_tpu_info().vmem_capacity_bytes)
        return (cap * 3) // 4                      # 96 MiB on v5e/v6e, 48 MiB on v7x
    except Exception:
        return 48 * 1024 * 1024                    # safe on every generation


# ---------------------------------------------------------------------------
# Fused kernel: x -> [Linear+ReLU]*K -> combined (policy|value) Linear
# ---------------------------------------------------------------------------
def _fused_mlp_kernel(*refs, n_layers: int):
    # refs = (x_ref, w0, b0, w1, b1, ..., w_{L-1}, b_{L-1}, o_ref)
    x_ref = refs[0]
    o_ref = refs[-1]

    h = x_ref[...]                                   # f32 activations
    for layer in range(n_layers):
        w = refs[1 + 2 * layer][...]                 # (in_pad, out_pad), bf16 or f32
        b = refs[2 + 2 * layer][...]                 # (1, out_pad), f32
        # MXU matmul in the weight dtype with f32 accumulation; bias add / ReLU in f32.
        h = jnp.dot(h.astype(w.dtype), w, preferred_element_type=jnp.float32) + b
        if layer != n_layers - 1:                    # ReLU after every layer but the head
            h = jnp.maximum(h, 0.0)
    o_ref[...] = h.astype(o_ref.dtype)


# ---------------------------------------------------------------------------
# Parameter init (PyTorch nn.Linear layout / init) and one-time layout prep
# ---------------------------------------------------------------------------
def _linear_init(key, fan_in, fan_out):
    wk, bk = jax.random.split(key)
    bound = 1.0 / (float(fan_in) ** 0.5)
    w = jax.random.uniform(wk, (fan_out, fan_in), jnp.float32, -bound, bound)
    b = jax.random.uniform(bk, (fan_out,), jnp.float32, -bound, bound)
    return w, b


def init_two_headed_mlp_params(key, sizes):
    """TwoHeadedMLP(*sizes): encoder = MLP(*sizes[:-1]), policy/value heads."""
    assert len(sizes) > 2
    enc_sizes = sizes[:-1]
    enc = []
    for i in range(1, len(enc_sizes)):
        key, sub = jax.random.split(key)
        enc.append(_linear_init(sub, enc_sizes[i - 1], enc_sizes[i]))
    key, pk, vk = jax.random.split(key, 3)
    policy = _linear_init(pk, sizes[-2], sizes[-1])
    value = _linear_init(vk, sizes[-2], 1)
    return {"encoder": enc, "policy": policy, "value": value}


def prepare_fused_params(params, param_dtype=jnp.bfloat16):
    """One-time layout prep (NOT in the hot path):
      * transpose every weight to (in, out) and cast to `param_dtype`
        (bf16 default: halves weight DMA/VMEM, fast MXU path on v6e/v7x; biases and
        all elementwise math stay f32, so this is also safe on v5e),
      * zero-pad all feature dims to multiples of 128 (numerically exact),
      * pack policy + value heads into one lane-dense combined head.
    Returns {"layers", "policy_dim", "true_dims"}."""
    pw, pb = params["policy"]
    vw, vb = params["value"]
    policy_dim = int(pw.shape[0])

    layer_list = list(params["encoder"])
    head_w = jnp.concatenate([pw, vw], axis=0)       # (policy_dim + 1, hidden)
    head_b = jnp.concatenate([pb, vb], axis=0)
    layer_list.append((head_w, head_b))

    fused, true_dims = [], []
    for w, b in layer_list:                          # w: (out, in) PyTorch layout
        out_dim, in_dim = int(w.shape[0]), int(w.shape[1])
        in_pad, out_pad = _round_up(in_dim, _LANE), _round_up(out_dim, _LANE)
        w_t = (jnp.zeros((in_pad, out_pad), jnp.float32)
               .at[:in_dim, :out_dim].set(w.T).astype(param_dtype))
        b2 = jnp.zeros((1, out_pad), jnp.float32).at[:, :out_dim].set(b)
        fused.append((w_t, b2))
        true_dims.append((in_dim, out_dim))
    return {"layers": fused, "policy_dim": policy_dim, "true_dims": true_dims}


# ---------------------------------------------------------------------------
# Forward wrapper
# ---------------------------------------------------------------------------
def two_headed_mlp_forward(fused, x, *, batch_tile=512, out_dtype=jnp.float32):
    layers = fused["layers"]
    policy_dim = fused["policy_dim"]
    true_dims = fused["true_dims"]

    if x.ndim > 2:
        x = x.reshape(x.shape[0], -1)                # PyTorch x.view(x.size(0), -1)
    B, in_dim = x.shape
    in_pad = layers[0][0].shape[0]
    out_pad = layers[-1][0].shape[1]
    n_layers = len(layers)

    # ---- batch tiling (tm always a multiple of 8) ---------------------------
    b_pad = _round_up(B, _SUBLANE)
    tm = min(b_pad, max(_SUBLANE, (batch_tile // _SUBLANE) * _SUBLANE))
    # v7x has 2 TensorCores per chip: prefer >= 2 grid steps when the batch allows
    # it so neither core idles (the batch axis is marked "parallel").
    if b_pad // tm < 2 and b_pad >= 2 * _SUBLANE:
        tm = _round_up(pl.cdiv(b_pad, 2), _SUBLANE)
    b_pad = _round_up(B, tm)
    grid_steps = b_pad // tm

    # ---- pad the input only when actually needed (avoids an extra HBM pass) --
    if (B, in_dim) == (b_pad, in_pad):
        x_pad = x.astype(jnp.float32)
    else:
        x_pad = jnp.zeros((b_pad, in_pad), jnp.float32).at[:B, :in_dim].set(x)

    # ---- cost estimate from TRUE (unpadded) dims ----------------------------
    w_itemsize = layers[0][0].dtype.itemsize
    flops = int(2 * B * sum(i * o for i, o in true_dims))
    bytes_accessed = int(4 * B * true_dims[0][0]
                         + sum(i * o * w_itemsize + o * 4 for i, o in true_dims)
                         + jnp.dtype(out_dtype).itemsize * B * true_dims[-1][1])

    # ---- VMEM footprint / budget --------------------------------------------
    resident_param_bytes = sum(int(w.size) * w.dtype.itemsize
                               + int(b.size) * b.dtype.itemsize for w, b in layers)
    act_bytes = 2 * tm * in_pad * 4 + 2 * tm * out_pad * jnp.dtype(out_dtype).itemsize
    widest = max([in_pad] + [int(w.shape[1]) for w, _ in layers])
    live_bytes = 2 * tm * widest * 4                 # in-flight intermediate activations
    ceiling = _vmem_ceiling_bytes()

    def run(single_buffer_weights: bool):
        weight_bufs = 1 if single_buffer_weights else 2
        footprint = resident_param_bytes * weight_bufs + act_bytes + live_bytes
        if footprint > ceiling:
            # TODO(synk): stream weights over an extra grid axis (P3 accumulator or
            # pltpu.emit_pipeline over layers) when the resident weight stack exceeds
            # the per-core VMEM budget (mainly relevant on v7x, 64 MiB physical).
            raise NotImplementedError(
                f"resident footprint {footprint} B exceeds VMEM budget {ceiling} B")
        vmem_limit = int(min(max(footprint + (4 << 20), 32 << 20), ceiling))

        weight_kw = {"pipeline_mode": pl.Buffered(1)} if single_buffer_weights else {}
        in_specs = [pl.BlockSpec((tm, in_pad), lambda i: (i, 0))]
        flat = []
        for w, b in layers:
            flat += [w, b]
            # Constant block index => weights stay VMEM-resident across the grid;
            # Buffered(1) avoids allocating a useless second buffer for them.
            in_specs.append(pl.BlockSpec(w.shape, lambda i: (0, 0), **weight_kw))
            in_specs.append(pl.BlockSpec(b.shape, lambda i: (0, 0), **weight_kw))

        return pl.pallas_call(
            functools.partial(_fused_mlp_kernel, n_layers=n_layers),
            out_shape=jax.ShapeDtypeStruct((b_pad, out_pad), out_dtype),
            grid=(grid_steps,),
            in_specs=in_specs,
            out_specs=pl.BlockSpec((tm, out_pad), lambda i: (i, 0)),
            compiler_params=pltpu.CompilerParams(
                dimension_semantics=("parallel",),   # shards batch across v7x's 2 TCs
                vmem_limit_bytes=vmem_limit),
            cost_estimate=pl.CostEstimate(
                flops=flops, transcendentals=0, bytes_accessed=bytes_accessed),
        )(x_pad, *flat)

    try:
        out_full = run(single_buffer_weights=True)
    except NotImplementedError:
        raise
    except Exception:
        # Fallback for JAX builds where pl.Buffered(1) single-buffering of
        # constant-index inputs is rejected: default double-buffering (still correct).
        out_full = run(single_buffer_weights=False)

    policy = out_full[:B, :policy_dim]
    value = out_full[:B, policy_dim:policy_dim + 1]
    return policy, value


# ---------------------------------------------------------------------------
# Pure-JAX reference (PyTorch semantics)
# ---------------------------------------------------------------------------
def two_headed_mlp_reference(params, x):
    if x.ndim > 2:
        x = x.reshape(x.shape[0], -1)
    enc = params["encoder"]
    h = x
    for idx, (w, b) in enumerate(enc):
        h = h @ w.T + b
        if idx != len(enc) - 1:
            h = jnp.maximum(h, 0.0)                  # ReLU inside MLP
    h = jnp.maximum(h, 0.0)                          # F.relu(self.encoder(x))
    pw, pb = params["policy"]
    vw, vb = params["value"]
    return h @ pw.T + pb, h @ vw.T + vb


if __name__ == "__main__":
    key = jax.random.PRNGKey(0)

    # --- Test 1: TwoHeadedMLP(64, 32, 16) on a 4-D input (flattens to (2, 64)) ---
    sizes = (64, 32, 16)
    key, pk, xk = jax.random.split(key, 3)
    params = init_two_headed_mlp_params(pk, sizes)
    x = jax.random.normal(xk, (2, 4, 4, 4), jnp.float32)

    fused = prepare_fused_params(params)             # one-time layout prep (bf16 weights)
    policy, value = two_headed_mlp_forward(fused, x)
    policy, value = jax.block_until_ready((policy, value))
    p_ref, v_ref = two_headed_mlp_reference(params, x)

    tol = 5e-2 if fused["layers"][0][0].dtype == jnp.bfloat16 else 1e-5
    assert policy.shape == (2, sizes[-1]), policy.shape
    assert value.shape == (2, 1), value.shape
    assert jnp.allclose(policy, p_ref, atol=tol, rtol=tol), "policy mismatch (test 1)"
    assert jnp.allclose(value, v_ref, atol=tol, rtol=tol), "value mismatch (test 1)"

    # --- Test 2: deeper encoder + larger batch (exercises the >=2-step batch grid) ---
    sizes2 = (48, 64, 32, 10)
    key, pk2, xk2 = jax.random.split(key, 3)
    params2 = init_two_headed_mlp_params(pk2, sizes2)
    x2 = jax.random.normal(xk2, (300, 48), jnp.float32)

    fused2 = prepare_fused_params(params2)
    policy2, value2 = two_headed_mlp_forward(fused2, x2)
    policy2, value2 = jax.block_until_ready((policy2, value2))
    p2_ref, v2_ref = two_headed_mlp_reference(params2, x2)

    assert policy2.shape == (300, sizes2[-1]), policy2.shape
    assert value2.shape == (300, 1), value2.shape
    assert jnp.allclose(policy2, p2_ref, atol=tol, rtol=tol), "policy mismatch (test 2)"
    assert jnp.allclose(value2, v2_ref, atol=tol, rtol=tol), "value mismatch (test 2)"

    print("KERNEL_OK")
</pallas_src>

<mosaic_0001>
module attributes {stable_mosaic.version = 11 : i64} {
  func.func @_fused_mlp_kernel(%arg0: i32, %arg1: memref<8x128xf32, #tpu.memory_space<vmem>>, %arg2: memref<128x128xbf16, #tpu.memory_space<vmem>>, %arg3: memref<1x128xf32, #tpu.memory_space<vmem>>, %arg4: memref<128x128xbf16, #tpu.memory_space<vmem>>, %arg5: memref<1x128xf32, #tpu.memory_space<vmem>>, %arg6: memref<8x128xf32, #tpu.memory_space<vmem>>) attributes {dimension_semantics = [#tpu.dimension_semantics<parallel>], iteration_bounds = array<i64: 1>, scalar_prefetch = 0 : i64, scratch_operands = 0 : i64, tpu.core_type = #tpu.core_type<tc>, window_params = [{transform_indices = @transform_0, window_bounds = array<i64: 8, 128>}, {pipeline_mode = #tpu.pipeline_mode<synchronous>, transform_indices = @transform_1, window_bounds = array<i64: 128, 128>}, {pipeline_mode = #tpu.pipeline_mode<synchronous>, transform_indices = @transform_2, window_bounds = array<i64: 1, 128>}, {pipeline_mode = #tpu.pipeline_mode<synchronous>, transform_indices = @transform_3, window_bounds = array<i64: 128, 128>}, {pipeline_mode = #tpu.pipeline_mode<synchronous>, transform_indices = @transform_4, window_bounds = array<i64: 1, 128>}, {transform_indices = @transform_5, window_bounds = array<i64: 8, 128>}]} {
    %c0 = arith.constant 0 : index
    %c0_0 = arith.constant 0 : index
    %0 = vector.load %arg1[%c0, %c0_0] : memref<8x128xf32, #tpu.memory_space<vmem>>, vector<8x128xf32>
    %c0_1 = arith.constant 0 : index
    %c0_2 = arith.constant 0 : index
    %1 = vector.load %arg2[%c0_1, %c0_2] : memref<128x128xbf16, #tpu.memory_space<vmem>>, vector<128x128xbf16>
    %c0_3 = arith.constant 0 : index
    %c0_4 = arith.constant 0 : index
    %2 = vector.load %arg3[%c0_3, %c0_4] : memref<1x128xf32, #tpu.memory_space<vmem>>, vector<1x128xf32>
    %3 = arith.truncf %0 : vector<8x128xf32> to vector<8x128xbf16>
    %cst = arith.constant dense<0.000000e+00> : vector<8x128xf32>
    %4 = tpu.matmul %3, %1, %cst {dimension_numbers = #tpu.dot_dimension_numbers<[1], [0], [0], [1], [0, 0, 1, 1], [], []>} : vector<8x128xbf16>, vector<128x128xbf16>, vector<8x128xf32> -> vector<8x128xf32>
    %5 = vector.broadcast %2 : vector<1x128xf32> to vector<8x128xf32>
    %6 = arith.addf %4, %5 : vector<8x128xf32>
    %cst_5 = arith.constant 0.000000e+00 : f32
    %7 = vector.broadcast %cst_5 : f32 to vector<8x128xf32>
    %8 = arith.maximumf %6, %7 : vector<8x128xf32>
    %c0_6 = arith.constant 0 : index
    %c0_7 = arith.constant 0 : index
    %9 = vector.load %arg4[%c0_6, %c0_7] : memref<128x128xbf16, #tpu.memory_space<vmem>>, vector<128x128xbf16>
    %c0_8 = arith.constant 0 : index
    %c0_9 = arith.constant 0 : index
    %10 = vector.load %arg5[%c0_8, %c0_9] : memref<1x128xf32, #tpu.memory_space<vmem>>, vector<1x128xf32>
    %11 = arith.truncf %8 : vector<8x128xf32> to vector<8x128xbf16>
    %cst_10 = arith.constant dense<0.000000e+00> : vector<8x128xf32>
    %12 = tpu.matmul %11, %9, %cst_10 {dimension_numbers = #tpu.dot_dimension_numbers<[1], [0], [0], [1], [0, 0, 1, 1], [], []>} : vector<8x128xbf16>, vector<128x128xbf16>, vector<8x128xf32> -> vector<8x128xf32>
    %13 = vector.broadcast %10 : vector<1x128xf32> to vector<8x128xf32>
    %14 = arith.addf %12, %13 : vector<8x128xf32>
    %c0_11 = arith.constant 0 : index
    %c0_12 = arith.constant 0 : index
    %15 = vector.load %arg6[%c0_11, %c0_12] : memref<8x128xf32, #tpu.memory_space<vmem>>, vector<8x128xf32>
    tpu.vector_store %arg6[%c0_11, %c0_12], %14 {strides = array<i32>} : memref<8x128xf32, #tpu.memory_space<vmem>>, vector<8x128xf32>,
    return
  }
  func.func @transform_0(%arg0: i32) -> (i32, i32) {
    %c0_i32 = arith.constant 0 : i32
    %c0_i32_0 = arith.constant 0 : i32
    return %arg0, %c0_i32 : i32, i32
  }
  func.func @transform_1(%arg0: i32) -> (i32, i32) {
    %c0_i32 = arith.constant 0 : i32
    %c0_i32_0 = arith.constant 0 : i32
    %c0_i32_1 = arith.constant 0 : i32
    return %c0_i32, %c0_i32_0 : i32, i32
  }
  func.func @transform_2(%arg0: i32) -> (i32, i32) {
    %c0_i32 = arith.constant 0 : i32
    %c0_i32_0 = arith.constant 0 : i32
    %c0_i32_1 = arith.constant 0 : i32
    return %c0_i32, %c0_i32_0 : i32, i32
  }
  func.func @transform_3(%arg0: i32) -> (i32, i32) {
    %c0_i32 = arith.constant 0 : i32
    %c0_i32_0 = arith.constant 0 : i32
    %c0_i32_1 = arith.constant 0 : i32
    return %c0_i32, %c0_i32_0 : i32, i32
  }
  func.func @transform_4(%arg0: i32) -> (i32, i32) {
    %c0_i32 = arith.constant 0 : i32
    %c0_i32_0 = arith.constant 0 : i32
    %c0_i32_1 = arith.constant 0 : i32
    return %c0_i32, %c0_i32_0 : i32, i32
  }
  func.func @transform_5(%arg0: i32) -> (i32, i32) {
    %c0_i32 = arith.constant 0 : i32
    %c0_i32_0 = arith.constant 0 : i32
    return %arg0, %c0_i32 : i32, i32
  }
}

module attributes {stable_mosaic.version = 11 : i64} {
  func.func @_fused_mlp_kernel(%arg0: i32, %arg1: memref<8x128xf32, #tpu.memory_space<vmem>>, %arg2: memref<128x128xbf16, #tpu.memory_space<vmem>>, %arg3: memref<1x128xf32, #tpu.memory_space<vmem>>, %arg4: memref<128x128xbf16, #tpu.memory_space<vmem>>, %arg5: memref<1x128xf32, #tpu.memory_space<vmem>>, %arg6: memref<8x128xf32, #tpu.memory_space<vmem>>) attributes {dimension_semantics = [#tpu.dimension_semantics<parallel>], iteration_bounds = array<i64: 1>, scalar_prefetch = 0 : i64, scratch_operands = 0 : i64, tpu.core_type = #tpu.core_type<tc>, window_params = [{transform_indices = @transform_0, window_bounds = array<i64: 8, 128>}, {pipeline_mode = #tpu.pipeline_mode<synchronous>, transform_indices = @transform_1, window_bounds = array<i64: 128, 128>}, {pipeline_mode = #tpu.pipeline_mode<synchronous>, transform_indices = @transform_2, window_bounds = array<i64: 1, 128>}, {pipeline_mode = #tpu.pipeline_mode<synchronous>, transform_indices = @transform_3, window_bounds = array<i64: 128, 128>}, {pipeline_mode = #tpu.pipeline_mode<synchronous>, transform_indices = @transform_4, window_bounds = array<i64: 1, 128>}, {transform_indices = @transform_5, window_bounds = array<i64: 8, 128>}]} {
    %c0 = arith.constant 0 : index
    %c0_0 = arith.constant 0 : index
    %0 = vector.load %arg1[%c0, %c0_0] : memref<8x128xf32, #tpu.memory_space<vmem>>, vector<8x128xf32>
    %c0_1 = arith.constant 0 : index
    %c0_2 = arith.constant 0 : index
    %1 = vector.load %arg2[%c0_1, %c0_2] : memref<128x128xbf16, #tpu.memory_space<vmem>>, vector<128x128xbf16>
    %c0_3 = arith.constant 0 : index
    %c0_4 = arith.constant 0 : index
    %2 = vector.load %arg3[%c0_3, %c0_4] : memref<1x128xf32, #tpu.memory_space<vmem>>, vector<1x128xf32>
    %3 = arith.truncf %0 : vector<8x128xf32> to vector<8x128xbf16>
    %cst = arith.constant dense<0.000000e+00> : vector<8x128xf32>
    %4 = tpu.matmul %3, %1, %cst {dimension_numbers = #tpu.dot_dimension_numbers<[1], [0], [0], [1], [0, 0, 1, 1], [], []>} : vector<8x128xbf16>, vector<128x128xbf16>, vector<8x128xf32> -> vector<8x128xf32>
    %5 = vector.broadcast %2 : vector<1x128xf32> to vector<8x128xf32>
    %6 = arith.addf %4, %5 : vector<8x128xf32>
    %cst_5 = arith.constant 0.000000e+00 : f32
    %7 = vector.broadcast %cst_5 : f32 to vector<8x128xf32>
    %8 = arith.maximumf %6, %7 : vector<8x128xf32>
    %c0_6 = arith.constant 0 : index
    %c0_7 = arith.constant 0 : index
    %9 = vector.load %arg4[%c0_6, %c0_7] : memref<128x128xbf16, #tpu.memory_space<vmem>>, vector<128x128xbf16>
    %c0_8 = arith.constant 0 : index
    %c0_9 = arith.constant 0 : index
    %10 = vector.load %arg5[%c0_8, %c0_9] : memref<1x128xf32, #tpu.memory_space<vmem>>, vector<1x128xf32>
    %11 = arith.truncf %8 : vector<8x128xf32> to vector<8x128xbf16>
    %cst_10 = arith.constant dense<0.000000e+00> : vector<8x128xf32>
    %12 = tpu.matmul %11, %9, %cst_10 {dimension_numbers = #tpu.dot_dimension_numbers<[1], [0], [0], [1], [0, 0, 1, 1], [], []>} : vector<8x128xbf16>, vector<128x128xbf16>, vector<8x128xf32> -> vector<8x128xf32>
    %13 = vector.broadcast %10 : vector<1x128xf32> to vector<8x128xf32>
    %14 = arith.addf %12, %13 : vector<8x128xf32>
    %c0_11 = arith.constant 0 : index
    %c0_12 = arith.constant 0 : index
    %15 = vector.load %arg6[%c0_11, %c0_12] : memref<8x128xf32, #tpu.memory_space<vmem>>, vector<8x128xf32>
    tpu.vector_store %arg6[%c0_11, %c0_12], %14 {strides = array<i32>} : memref<8x128xf32, #tpu.memory_space<vmem>>, vector<8x128xf32>,
    return
  }
  func.func @transform_0(%arg0: i32) -> (i32, i32) {
    %c0_i32 = arith.constant 0 : i32
    %c0_i32_0 = arith.constant 0 : i32
    return %arg0, %c0_i32 : i32, i32
  }
  func.func @transform_1(%arg0: i32) -> (i32, i32) {
    %c0_i32 = arith.constant 0 : i32
    %c0_i32_0 = arith.constant 0 : i32
    %c0_i32_1 = arith.constant 0 : i32
    return %c0_i32, %c0_i32_0 : i32, i32
  }
  func.func @transform_2(%arg0: i32) -> (i32, i32) {
    %c0_i32 = arith.constant 0 : i32
    %c0_i32_0 = arith.constant 0 : i32
    %c0_i32_1 = arith.constant 0 : i32
    return %c0_i32, %c0_i32_0 : i32, i32
  }
  func.func @transform_3(%arg0: i32) -> (i32, i32) {
    %c0_i32 = arith.constant 0 : i32
    %c0_i32_0 = arith.constant 0 : i32
    %c0_i32_1 = arith.constant 0 : i32
    return %c0_i32, %c0_i32_0 : i32, i32
  }
  func.func @transform_4(%arg0: i32) -> (i32, i32) {
    %c0_i32 = arith.constant 0 : i32
    %c0_i32_0 = arith.constant 0 : i32
    %c0_i32_1 = arith.constant 0 : i32
    return %c0_i32, %c0_i32_0 : i32, i32
  }
  func.func @transform_5(%arg0: i32) -> (i32, i32) {
    %c0_i32 = arith.constant 0 : i32
    %c0_i32_0 = arith.constant 0 : i32
    return %arg0, %c0_i32 : i32, i32
  }
}

</mosaic_0001>

<bundles_post_ra>
// kernel: tpu_custom_call.1
= control target key start
LH: loop header
LB: loop body
LE: loop exit
PB: predicated region body
PF: predicated region fallthrough
CT: control target
= control target key end

     0   :  { %10 = vsyncpa [#allocation3], 0  ;;  %s596_s0 = inlined_call_operand.hbm [shape: f32[8,128], index: 0, kind: input, shape index: {}]   ;;  %s597_s1 = inlined_call_operand.hbm [shape: bf16[128,128], index: 1, kind: input, shape index: {}]   ;;  %s598_s2 = inlined_call_operand.vmem [shape: f32[1,128], index: 2, kind: input, shape index: {}]   ;;  %s599_s3 = inlined_call_operand.hbm [shape: bf16[128,128], index: 3, kind: input, shape index: {}]   ;;  %s600_s4 = inlined_call_operand.vmem [shape: f32[1,128], index: 4, kind: input, shape index: {}]   ;;  %s601_s5 = inlined_call_operand.hbm [shape: f32[8,128], index: 5, kind: output, shape index: {}]  }
   0x1   :  { %11 = vsyncpa [#allocation6], 0 }
   0x2   :  { %12 = vsyncpa [#allocation4], 0  ;;  %s498_s18 = smov [#allocation5]   ;;  %s404_s22 = scalar_lea.hbm %s597_s1, 1024 }
   0x3   :  { %s28_s19 = sshll.u32 %s498_s18, 4  ;;  %p405_p0 = scmp.ne.s32.totalorder %s597_s1, %s404_s22  ;;  %s29_s19 = int_to_ptr.vmem [resolvable:$true] %s28_s19 }
   0x4   :  { %p408_p1 = scmp.lt.u32.totalorder %s404_s22, %s597_s1 }
   0x6   :  { %p410_p2 = pnand %p408_p1, %p405_p0 }
   0x8   :  { %413 = shalt.err (!%p410_p2)
}
   0x9   :  { %s414_s27 = scalar_lea.vmem %s29_s19, 1024  ;;  %p419_p4 = scmp.lt.s32.totalorder %s29_s19, %s29_s19 }
   0xa   :  { %p415_p3 = scmp.ne.s32.totalorder %s29_s19, %s414_s27  ;;  %p420_p5 = scmp.lt.s32.totalorder %s414_s27, %s414_s27 }
   0xc   :  { %p421_p6 = por %p420_p5, %p419_p4 }
   0xe   :  { %p422_p7 = pnand %p421_p6, %p415_p3 }
  0x10   :  { %425 = shalt.err (!%p422_p7)
}
  0x11   :  { %s499_s28 = smov 64   ;;  %s500_s29 = smov 4  }
  0x12   :  { %34 = dma.hbm_to_vmem [thread:$0]  %s597_s1, 1024, %s29_s19, [#allocation6], %s499_s28, %s499_s28, %s500_s29  }
  0x13   :  { %s501_s7 = smov [#allocation2]   ;;  %s502_s9 = smov [#allocation7]  }
  0x14   :  { %s19_s8 = sshll.u32 %s501_s7, 4  ;;  %s42_s10 = sshll.u32 %s502_s9, 4  ;;  %s20_s8 = int_to_ptr.vmem [resolvable:$true] %s19_s8  ;;  %s43_s10 = int_to_ptr.vmem [resolvable:$true] %s42_s10 }
  0x15   :  { %s426_s13 = scalar_lea.hbm %s596_s0, 128 }
  0x16   :  { %p427_p8 = scmp.ne.s32.totalorder %s596_s0, %s426_s13  ;;  %p430_p9 = scmp.lt.u32.totalorder %s426_s13, %s596_s0 }
  0x18   :  { %p432_p10 = pnand %p430_p9, %p427_p8 }
  0x1a   :  { %435 = shalt.err (!%p432_p10)
}
  0x1b   :  { %s436_s1 = scalar_lea.vmem %s20_s8, 128  ;;  %p441_p12 = scmp.lt.s32.totalorder %s20_s8, %s20_s8 }
  0x1c   :  { %p437_p11 = scmp.ne.s32.totalorder %s20_s8, %s436_s1  ;;  %p442_p13 = scmp.lt.s32.totalorder %s436_s1, %s436_s1 }
  0x1e   :  { %p443_p0 = por %p442_p13, %p441_p12 }
  0x20   :  { %p444_p1 = pnand %p443_p0, %p437_p11 }
  0x22   :  { %447 = shalt.err (!%p444_p1)
}
  0x23   :  { %22 = dma.hbm_to_vmem [thread:$0]  %s596_s0, 128, %s20_s8, [#allocation3]  }
  0x24   :  { %s448_s22 = scalar_lea.hbm %s599_s3, 1024 }
  0x25   :  { %p449_p2 = scmp.ne.s32.totalorder %s599_s3, %s448_s22  ;;  %p452_p3 = scmp.lt.u32.totalorder %s448_s22, %s599_s3 }
  0x27   :  { %p454_p4 = pnand %p452_p3, %p449_p2 }
  0x29   :  { %457 = shalt.err (!%p454_p4)
}
  0x2a   :  { %s458_s27 = scalar_lea.vmem %s43_s10, 1024  ;;  %p463_p6 = scmp.lt.s32.totalorder %s43_s10, %s43_s10 }
  0x2b   :  { %p459_p5 = scmp.ne.s32.totalorder %s43_s10, %s458_s27  ;;  %p464_p7 = scmp.lt.s32.totalorder %s458_s27, %s458_s27 }
  0x2d   :  { %p465_p8 = por %p464_p7, %p463_p6 }
  0x2f   :  { %p466_p9 = pnand %p465_p8, %p459_p5 }
  0x31   :  { %469 = shalt.err (!%p466_p9)
}
  0x32   :  { %48 = dma.hbm_to_vmem [thread:$0]  %s599_s3, 1024, %s43_s10, [#allocation6], %s499_s28, %s499_s28, %s500_s29  }
  0x33   :  { %492 = dma.done.wait [#allocation3], 128  }
  0x34   :  { %493 = vsyncadd [#allocation3], 4294967168 }
  0x35   :  { %494 = dma.done.wait [#allocation6], 2048  }
  0x36   :  { %495 = vsyncadd [#allocation6], 4294965248  ;;  %v503_v0 = vmov 0.0   ;;  %vm504_vm0 = vmmov 0   ;;  %v388_v1 = vld [vmem:[#allocation5] sm:$0xff]   ;;  %v389_v2 = vld [vmem:[#allocation5 + $0x8] sm:$0xff]  }
  0x37   :  { %340 = vmatprep.subr.bf16.mxu0 %v503_v0  ;;  %356 = vmatprep.mubr.msk.bf16.mxu0 %vm504_vm0, %v503_v0  ;;  %v390_v3 = vld [vmem:[#allocation5 + $0x10] sm:$0xff]   ;;  %v396_v4 = vld [vmem:[#allocation7] sm:$0xff]   ;;  %v391_v5 = vld [vmem:[#allocation5 + $0x18] sm:$0xff]   ;;  %s505_s7 = smov [#allocation8]  }
  0x38   :  { %360 = vmatprep.subr.bf16.mxu1 %v503_v0  ;;  %376 = vmatprep.mubr.msk.bf16.mxu1 %vm504_vm0, %v503_v0  ;;  %v397_v6 = vld [vmem:[#allocation7 + $0x8] sm:$0xff]   ;;  %v392_v7 = vld [vmem:[#allocation5 + $0x20] sm:$0xff]   ;;  %v398_v8 = vld [vmem:[#allocation7 + $0x10] sm:$0xff]   ;;  %s294_s8 = sshll.u32 %s505_s7, 4  ;;  %s295_s8 = int_to_ptr.vmem [resolvable:$true] %s294_s8 }
  0x39   :  { %341 = vmatpush3.bf16.msra.mxu0 %v388_v1  ;;  %361 = vmatpush3.bf16.msra.mxu1 %v396_v4  ;;  %v393_v9 = vld [vmem:[#allocation5 + $0x28] sm:$0xff]   ;;  %v399_v10 = vld [vmem:[#allocation7 + $0x18] sm:$0xff]   ;;  %v394_v11 = vld [vmem:[#allocation5 + $0x30] sm:$0xff]   ;;  %p475_p11 = scmp.lt.s32.totalorder %s295_s8, %s295_s8 }
  0x3a   :  { %342 = vmatprep.subr.bf16.mxu0 %v503_v0  ;;  %362 = vmatprep.subr.bf16.mxu1 %v503_v0  ;;  %v400_v12 = vld [vmem:[#allocation7 + $0x20] sm:$0xff]   ;;  %v395_v13 = vld [vmem:[#allocation5 + $0x38] sm:$0xff]   ;;  %v401_v15 = vld [vmem:[#allocation7 + $0x28] sm:$0xff]  }
  0x3b   :  { %v61_v14 = vld [vmem:[#allocation2] sm:$0xff]  ;;  %v402_v17 = vld [vmem:[#allocation7 + $0x30] sm:$0xff]  }
  0x3c   :  { %v79_v16 = vpack.c.bf16 %v61_v14, %v61_v14  ;;  %v403_v18 = vld [vmem:[#allocation7 + $0x38] sm:$0xff]  }
  0x3d   :  { %343 = vmatpush3.bf16.msra.mxu0 %v389_v2  ;;  %363 = vmatpush3.bf16.msra.mxu1 %v397_v6  ;;  %v304_v19 = vld [vmem:[%s598_s2] ss:$0 sm:$0xff]  ;;  %s470_s2 = scalar_lea.vmem %s295_s8, 128 }
  0x3e   :  { %344 = vmatprep.subr.bf16.mxu0 %v503_v0  ;;  %364 = vmatprep.subr.bf16.mxu1 %v503_v0  ;;  %v313_v27 = vld [vmem:[%s600_s4] ss:$0 sm:$0xff]  ;;  %p471_p10 = scmp.ne.s32.totalorder %s295_s8, %s470_s2  ;;  %p476_p12 = scmp.lt.s32.totalorder %s470_s2, %s470_s2 }
  0x40   :  { %p477_p13 = por %p476_p12, %p475_p11 }
  0x41   :  { %345 = vmatpush3.bf16.msra.mxu0 %v390_v3  ;;  %365 = vmatpush3.bf16.msra.mxu1 %v398_v8 }
  0x42   :  { %346 = vmatprep.subr.bf16.mxu0 %v503_v0  ;;  %366 = vmatprep.subr.bf16.mxu1 %v503_v0  ;;  %p478_p0 = pnand %p477_p13, %p471_p10 }
  0x45   :  { %347 = vmatpush3.bf16.msra.mxu0 %v391_v5  ;;  %367 = vmatpush3.bf16.msra.mxu1 %v399_v10 }
  0x46   :  { %348 = vmatprep.subr.bf16.mxu0 %v503_v0  ;;  %368 = vmatprep.subr.bf16.mxu1 %v503_v0 }
  0x49   :  { %349 = vmatpush3.bf16.msra.mxu0 %v392_v7  ;;  %369 = vmatpush3.bf16.msra.mxu1 %v400_v12 }
  0x4a   :  { %350 = vmatprep.subr.bf16.mxu0 %v503_v0  ;;  %370 = vmatprep.subr.bf16.mxu1 %v503_v0 }
  0x4d   :  { %351 = vmatpush3.bf16.msra.mxu0 %v393_v9  ;;  %371 = vmatpush3.bf16.msra.mxu1 %v401_v15 }
  0x4e   :  { %352 = vmatprep.subr.bf16.mxu0 %v503_v0  ;;  %372 = vmatprep.subr.bf16.mxu1 %v503_v0 }
  0x51   :  { %353 = vmatpush3.bf16.msra.mxu0 %v394_v11  ;;  %373 = vmatpush3.bf16.msra.mxu1 %v402_v17 }
  0x52   :  { %354 = vmatprep.subr.bf16.mxu0 %v503_v0  ;;  %374 = vmatprep.subr.bf16.mxu1 %v503_v0 }
  0x55   :  { %355 = vmatpush3.bf16.msra.mxu0 %v395_v13  ;;  %375 = vmatpush3.bf16.msra.mxu1 %v403_v18 }
  0x58   :  { %357 = vmatmul.mubr.bf16.vlgmr.msra.gmra.mrb[0].mxu0 %v79_v16 }
 0x12b   :  { %v168_v20 = vpop.f32.mrb[0].mxu0 }
 0x12c   :  { %v169_v21 = vadd.f32 %v304_v19, %v168_v20  ;;  %v358_v22 = vpop.f32.mrb[1].mxu0 }
 0x12d   :  { %v171_v23 = vpop.f32.mrb[2].mxu0 }
 0x12e   :  { %v174_v24 = vmax.f32 %v169_v21, 0.0  ;;  %v359_v25 = vpop.f32.mrb[3].mxu0 }
 0x130   :  { %v192_v26 = vpack.c.bf16 %v174_v24, %v174_v24 }
 0x132   :  { %377 = vmatmul.mubr.bf16.vlgmr.msra.gmra.mrb[0].mxu1 %v192_v26 }
 0x205   :  { %v281_v28 = vpop.f32.mrb[0].mxu1 }
 0x206   :  { %v282_v29 = vadd.f32 %v313_v27, %v281_v28  ;;  %v378_v30 = vpop.f32.mrb[1].mxu1 }
 0x207   :  { %v284_v31 = vpop.f32.mrb[2].mxu1 }
 0x208   :  { %287 = vst [vmem:[#allocation8] sm:$0xff] %v282_v29  ;;  %v379_v32 = vpop.f32.mrb[3].mxu1 }
 0x209   :  { %481 = shalt.err (!%p478_p0)
}
 0x20a   :  { %s482_s4 = scalar_lea.hbm %s601_s5, 128 }
 0x20b   :  { %p483_p1 = scmp.ne.s32.totalorder %s601_s5, %s482_s4  ;;  %p486_p2 = scmp.lt.u32.totalorder %s482_s4, %s601_s5 }
 0x20d   :  { %p488_p3 = pnand %p486_p2, %p483_p1 }
 0x20f   :  { %491 = shalt.err (!%p488_p3)
}
 0x210   :  { %297 = dma.vmem_to_hbm [thread:$0]  %s295_s8, 128, %s601_s5, [#allocation4]  }
 0x211   :  { %496 = dma.done.wait [#allocation4], 128  }
 0x212   :  { %497 = vsyncadd [#allocation4], 4294967168 }
 0x213   :  { %301 = vsyncpa [#allocation3], 1 }
 0x214   :  { %302 = vsyncpa [#allocation6], 1 }
 0x215   :  { %303 = vsyncpa [#allocation4], 1 }

// kernel: tpu_custom_call.1
= control target key start
LH: loop header
LB: loop body
LE: loop exit
PB: predicated region body
PF: predicated region fallthrough
CT: control target
= control target key end

     0   :  { %10 = vsyncpa [#allocation3], 0  ;;  %s596_s0 = inlined_call_operand.hbm [shape: f32[8,128], index: 0, kind: input, shape index: {}]   ;;  %s597_s1 = inlined_call_operand.hbm [shape: bf16[128,128], index: 1, kind: input, shape index: {}]   ;;  %s598_s2 = inlined_call_operand.vmem [shape: f32[1,128], index: 2, kind: input, shape index: {}]   ;;  %s599_s3 = inlined_call_operand.hbm [shape: bf16[128,128], index: 3, kind: input, shape index: {}]   ;;  %s600_s4 = inlined_call_operand.vmem [shape: f32[1,128], index: 4, kind: input, shape index: {}]   ;;  %s601_s5 = inlined_call_operand.hbm [shape: f32[8,128], index: 5, kind: output, shape index: {}]  }
   0x1   :  { %11 = vsyncpa [#allocation6], 0 }
   0x2   :  { %12 = vsyncpa [#allocation4], 0  ;;  %s498_s18 = smov [#allocation5]   ;;  %s404_s22 = scalar_lea.hbm %s597_s1, 1024 }
   0x3   :  { %s28_s19 = sshll.u32 %s498_s18, 4  ;;  %p405_p0 = scmp.ne.s32.totalorder %s597_s1, %s404_s22  ;;  %s29_s19 = int_to_ptr.vmem [resolvable:$true] %s28_s19 }
   0x4   :  { %p408_p1 = scmp.lt.u32.totalorder %s404_s22, %s597_s1 }
   0x6   :  { %p410_p2 = pnand %p408_p1, %p405_p0 }
   0x8   :  { %413 = shalt.err (!%p410_p2)
}
   0x9   :  { %s414_s27 = scalar_lea.vmem %s29_s19, 1024  ;;  %p419_p4 = scmp.lt.s32.totalorder %s29_s19, %s29_s19 }
   0xa   :  { %p415_p3 = scmp.ne.s32.totalorder %s29_s19, %s414_s27  ;;  %p420_p5 = scmp.lt.s32.totalorder %s414_s27, %s414_s27 }
   0xc   :  { %p421_p6 = por %p420_p5, %p419_p4 }
   0xe   :  { %p422_p7 = pnand %p421_p6, %p415_p3 }
  0x10   :  { %425 = shalt.err (!%p422_p7)
}
  0x11   :  { %s499_s28 = smov 64   ;;  %s500_s29 = smov 4  }
  0x12   :  { %34 = dma.hbm_to_vmem [thread:$0]  %s597_s1, 1024, %s29_s19, [#allocation6], %s499_s28, %s499_s28, %s500_s29  }
  0x13   :  { %s501_s7 = smov [#allocation2]   ;;  %s502_s9 = smov [#allocation7]  }
  0x14   :  { %s19_s8 = sshll.u32 %s501_s7, 4  ;;  %s42_s10 = sshll.u32 %s502_s9, 4  ;;  %s20_s8 = int_to_ptr.vmem [resolvable:$true] %s19_s8  ;;  %s43_s10 = int_to_ptr.vmem [resolvable:$true] %s42_s10 }
  0x15   :  { %s426_s13 = scalar_lea.hbm %s596_s0, 128 }
  0x16   :  { %p427_p8 = scmp.ne.s32.totalorder %s596_s0, %s426_s13  ;;  %p430_p9 = scmp.lt.u32.totalorder %s426_s13, %s596_s0 }
  0x18   :  { %p432_p10 = pnand %p430_p9, %p427_p8 }
  0x1a   :  { %435 = shalt.err (!%p432_p10)
}
  0x1b   :  { %s436_s1 = scalar_lea.vmem %s20_s8, 128  ;;  %p441_p12 = scmp.lt.s32.totalorder %s20_s8, %s20_s8 }
  0x1c   :  { %p437_p11 = scmp.ne.s32.totalorder %s20_s8, %s436_s1  ;;  %p442_p13 = scmp.lt.s32.totalorder %s436_s1, %s436_s1 }
  0x1e   :  { %p443_p0 = por %p442_p13, %p441_p12 }
  0x20   :  { %p444_p1 = pnand %p443_p0, %p437_p11 }
  0x22   :  { %447 = shalt.err (!%p444_p1)
}
  0x23   :  { %22 = dma.hbm_to_vmem [thread:$0]  %s596_s0, 128, %s20_s8, [#allocation3]  }
  0x24   :  { %s448_s22 = scalar_lea.hbm %s599_s3, 1024 }
  0x25   :  { %p449_p2 = scmp.ne.s32.totalorder %s599_s3, %s448_s22  ;;  %p452_p3 = scmp.lt.u32.totalorder %s448_s22, %s599_s3 }
  0x27   :  { %p454_p4 = pnand %p452_p3, %p449_p2 }
  0x29   :  { %457 = shalt.err (!%p454_p4)
}
  0x2a   :  { %s458_s27 = scalar_lea.vmem %s43_s10, 1024  ;;  %p463_p6 = scmp.lt.s32.totalorder %s43_s10, %s43_s10 }
  0x2b   :  { %p459_p5 = scmp.ne.s32.totalorder %s43_s10, %s458_s27  ;;  %p464_p7 = scmp.lt.s32.totalorder %s458_s27, %s458_s27 }
  0x2d   :  { %p465_p8 = por %p464_p7, %p463_p6 }
  0x2f   :  { %p466_p9 = pnand %p465_p8, %p459_p5 }
  0x31   :  { %469 = shalt.err (!%p466_p9)
}
  0x32   :  { %48 = dma.hbm_to_vmem [thread:$0]  %s599_s3, 1024, %s43_s10, [#allocation6], %s499_s28, %s499_s28, %s500_s29  }
  0x33   :  { %492 = dma.done.wait [#allocation3], 128  }
  0x34   :  { %493 = vsyncadd [#allocation3], 4294967168 }
  0x35   :  { %494 = dma.done.wait [#allocation6], 2048  }
  0x36   :  { %495 = vsyncadd [#allocation6], 4294965248  ;;  %v503_v0 = vmov 0.0   ;;  %vm504_vm0 = vmmov 0   ;;  %v388_v1 = vld [vmem:[#allocation5] sm:$0xff]   ;;  %v389_v2 = vld [vmem:[#allocation5 + $0x8] sm:$0xff]  }
  0x37   :  { %340 = vmatprep.subr.bf16.mxu0 %v503_v0  ;;  %356 = vmatprep.mubr.msk.bf16.mxu0 %vm504_vm0, %v503_v0  ;;  %v390_v3 = vld [vmem:[#allocation5 + $0x10] sm:$0xff]   ;;  %v396_v4 = vld [vmem:[#allocation7] sm:$0xff]   ;;  %v391_v5 = vld [vmem:[#allocation5 + $0x18] sm:$0xff]   ;;  %s505_s7 = smov [#allocation8]  }
  0x38   :  { %360 = vmatprep.subr.bf16.mxu1 %v503_v0  ;;  %376 = vmatprep.mubr.msk.bf16.mxu1 %vm504_vm0, %v503_v0  ;;  %v397_v6 = vld [vmem:[#allocation7 + $0x8] sm:$0xff]   ;;  %v392_v7 = vld [vmem:[#allocation5 + $0x20] sm:$0xff]   ;;  %v398_v8 = vld [vmem:[#allocation7 + $0x10] sm:$0xff]   ;;  %s294_s8 = sshll.u32 %s505_s7, 4  ;;  %s295_s8 = int_to_ptr.vmem [resolvable:$true] %s294_s8 }
  0x39   :  { %341 = vmatpush3.bf16.msra.mxu0 %v388_v1  ;;  %361 = vmatpush3.bf16.msra.mxu1 %v396_v4  ;;  %v393_v9 = vld [vmem:[#allocation5 + $0x28] sm:$0xff]   ;;  %v399_v10 = vld [vmem:[#allocation7 + $0x18] sm:$0xff]   ;;  %v394_v11 = vld [vmem:[#allocation5 + $0x30] sm:$0xff]   ;;  %p475_p11 = scmp.lt.s32.totalorder %s295_s8, %s295_s8 }
  0x3a   :  { %342 = vmatprep.subr.bf16.mxu0 %v503_v0  ;;  %362 = vmatprep.subr.bf16.mxu1 %v503_v0  ;;  %v400_v12 = vld [vmem:[#allocation7 + $0x20] sm:$0xff]   ;;  %v395_v13 = vld [vmem:[#allocation5 + $0x38] sm:$0xff]   ;;  %v401_v15 = vld [vmem:[#allocation7 + $0x28] sm:$0xff]  }
  0x3b   :  { %v61_v14 = vld [vmem:[#allocation2] sm:$0xff]  ;;  %v402_v17 = vld [vmem:[#allocation7 + $0x30] sm:$0xff]  }
  0x3c   :  { %v79_v16 = vpack.c.bf16 %v61_v14, %v61_v14  ;;  %v403_v18 = vld [vmem:[#allocation7 + $0x38] sm:$0xff]  }
  0x3d   :  { %343 = vmatpush3.bf16.msra.mxu0 %v389_v2  ;;  %363 = vmatpush3.bf16.msra.mxu1 %v397_v6  ;;  %v304_v19 = vld [vmem:[%s598_s2] ss:$0 sm:$0xff]  ;;  %s470_s2 = scalar_lea.vmem %s295_s8, 128 }
  0x3e   :  { %344 = vmatprep.subr.bf16.mxu0 %v503_v0  ;;  %364 = vmatprep.subr.bf16.mxu1 %v503_v0  ;;  %v313_v27 = vld [vmem:[%s600_s4] ss:$0 sm:$0xff]  ;;  %p471_p10 = scmp.ne.s32.totalorder %s295_s8, %s470_s2  ;;  %p476_p12 = scmp.lt.s32.totalorder %s470_s2, %s470_s2 }
  0x40   :  { %p477_p13 = por %p476_p12, %p475_p11 }
  0x41   :  { %345 = vmatpush3.bf16.msra.mxu0 %v390_v3  ;;  %365 = vmatpush3.bf16.msra.mxu1 %v398_v8 }
  0x42   :  { %346 = vmatprep.subr.bf16.mxu0 %v503_v0  ;;  %366 = vmatprep.subr.bf16.mxu1 %v503_v0  ;;  %p478_p0 = pnand %p477_p13, %p471_p10 }
  0x45   :  { %347 = vmatpush3.bf16.msra.mxu0 %v391_v5  ;;  %367 = vmatpush3.bf16.msra.mxu1 %v399_v10 }
  0x46   :  { %348 = vmatprep.subr.bf16.mxu0 %v503_v0  ;;  %368 = vmatprep.subr.bf16.mxu1 %v503_v0 }
  0x49   :  { %349 = vmatpush3.bf16.msra.mxu0 %v392_v7  ;;  %369 = vmatpush3.bf16.msra.mxu1 %v400_v12 }
  0x4a   :  { %350 = vmatprep.subr.bf16.mxu0 %v503_v0  ;;  %370 = vmatprep.subr.bf16.mxu1 %v503_v0 }
  0x4d   :  { %351 = vmatpush3.bf16.msra.mxu0 %v393_v9  ;;  %371 = vmatpush3.bf16.msra.mxu1 %v401_v15 }
  0x4e   :  { %352 = vmatprep.subr.bf16.mxu0 %v503_v0  ;;  %372 = vmatprep.subr.bf16.mxu1 %v503_v0 }
  0x51   :  { %353 = vmatpush3.bf16.msra.mxu0 %v394_v11  ;;  %373 = vmatpush3.bf16.msra.mxu1 %v402_v17 }
  0x52   :  { %354 = vmatprep.subr.bf16.mxu0 %v503_v0  ;;  %374 = vmatprep.subr.bf16.mxu1 %v503_v0 }
  0x55   :  { %355 = vmatpush3.bf16.msra.mxu0 %v395_v13  ;;  %375 = vmatpush3.bf16.msra.mxu1 %v403_v18 }
  0x58   :  { %357 = vmatmul.mubr.bf16.vlgmr.msra.gmra.mrb[0].mxu0 %v79_v16 }
 0x12b   :  { %v168_v20 = vpop.f32.mrb[0].mxu0 }
 0x12c   :  { %v169_v21 = vadd.f32 %v304_v19, %v168_v20  ;;  %v358_v22 = vpop.f32.mrb[1].mxu0 }
 0x12d   :  { %v171_v23 = vpop.f32.mrb[2].mxu0 }
 0x12e   :  { %v174_v24 = vmax.f32 %v169_v21, 0.0  ;;  %v359_v25 = vpop.f32.mrb[3].mxu0 }
 0x130   :  { %v192_v26 = vpack.c.bf16 %v174_v24, %v174_v24 }
 0x132   :  { %377 = vmatmul.mubr.bf16.vlgmr.msra.gmra.mrb[0].mxu1 %v192_v26 }
 0x205   :  { %v281_v28 = vpop.f32.mrb[0].mxu1 }
 0x206   :  { %v282_v29 = vadd.f32 %v313_v27, %v281_v28  ;;  %v378_v30 = vpop.f32.mrb[1].mxu1 }
 0x207   :  { %v284_v31 = vpop.f32.mrb[2].mxu1 }
 0x208   :  { %287 = vst [vmem:[#allocation8] sm:$0xff] %v282_v29  ;;  %v379_v32 = vpop.f32.mrb[3].mxu1 }
 0x209   :  { %481 = shalt.err (!%p478_p0)
}
 0x20a   :  { %s482_s4 = scalar_lea.hbm %s601_s5, 128 }
 0x20b   :  { %p483_p1 = scmp.ne.s32.totalorder %s601_s5, %s482_s4  ;;  %p486_p2 = scmp.lt.u32.totalorder %s482_s4, %s601_s5 }
 0x20d   :  { %p488_p3 = pnand %p486_p2, %p483_p1 }
 0x20f   :  { %491 = shalt.err (!%p488_p3)
}
 0x210   :  { %297 = dma.vmem_to_hbm [thread:$0]  %s295_s8, 128, %s601_s5, [#allocation4]  }
 0x211   :  { %496 = dma.done.wait [#allocation4], 128  }
 0x212   :  { %497 = vsyncadd [#allocation4], 4294967168 }
 0x213   :  { %301 = vsyncpa [#allocation3], 1 }
 0x214   :  { %302 = vsyncpa [#allocation6], 1 }
 0x215   :  { %303 = vsyncpa [#allocation4], 1 }

</bundles_post_ra>
